<compile_context>
chip_gen: v6e
topology: v6e:2x2x1
jax: 0.10.0
libtpu: 0.0.40
codegen_flags: <defaults>
</compile_context>

<pallas_src>
import functools

import jax
import jax.numpy as jnp
from jax.experimental import pallas as pl
from jax.experimental.pallas import tpu as pltpu

LANE = 128  # TPU vreg lane width


def mlp_kernel(xt_ref, w1_ref, b1_ref, w2_ref, b2_ref, w3_ref, b3_ref, ot_ref):
    # Fused forward in transposed orientation (features on sublanes, batch on lanes):
    #   h1 = relu(W1 @ x^T + b1) ; h2 = relu(W2 @ h1 + b2) ; out = W3 @ h2 + b3
    xt = xt_ref[...]                                                   # (in, tile)

    h1 = jnp.dot(w1_ref[...], xt, preferred_element_type=jnp.float32)
    h1 = jnp.maximum(h1 + b1_ref[...], 0.0)                            # (64, tile) f32

    h2 = jnp.dot(w2_ref[...], h1.astype(w2_ref.dtype),
                 preferred_element_type=jnp.float32)
    h2 = jnp.maximum(h2 + b2_ref[...], 0.0)                            # (32, tile) f32

    out = jnp.dot(w3_ref[...], h2.astype(w3_ref.dtype),
                  preferred_element_type=jnp.float32)
    ot_ref[...] = (out + b3_ref[...]).astype(ot_ref.dtype)             # (out, tile)


def salary_predictor_forward(x, params, *, batch_tile=512,
                             compute_dtype=jnp.float32):
    """x: (B, input_size) f32.  params: PyTorch-layout weights/biases.

    batch_tile: lane-dense batch tile (rounded down to a multiple of 128);
    sweep 256-512 for large batches.  compute_dtype: jnp.bfloat16 on v6e/v7x
    halves HBM traffic (accumulation stays f32).
    """
    w1, b1 = params["w1"], params["b1"]   # (64, in),  (64, 1)
    w2, b2 = params["w2"], params["b2"]   # (32, 64),  (32, 1)
    w3, b3 = params["w3"], params["b3"]   # (out, 32), (out, 1)

    B, in_dim = x.shape
    out_dim = w3.shape[0]

    # --- choose lane-dense batch tiling ---------------------------------
    b_pad = max(LANE, pl.cdiv(B, LANE) * LANE)          # pad batch to lane width
    tile = max(LANE, (min(batch_tile, b_pad) // LANE) * LANE)
    b_pad = pl.cdiv(b_pad, tile) * tile                 # make tile divide b_pad
    grid = (b_pad // tile,)

    # --- present inputs in transposed, lane-dense layout ----------------
    xt = jnp.transpose(x).astype(compute_dtype)                       # (in, B)
    xt = jnp.pad(xt, ((0, 0), (0, b_pad - B)))                        # (in, b_pad)
    w1c = w1.astype(compute_dtype)
    w2c = w2.astype(compute_dtype)
    w3c = w3.astype(compute_dtype)
    b1f = b1.astype(jnp.float32)
    b2f = b2.astype(jnp.float32)
    b3f = b3.astype(jnp.float32)

    flops = 2 * b_pad * (in_dim * 64 + 64 * 32 + 32 * out_dim)
    bytes_accessed = (
        xt.size * xt.dtype.itemsize
        + sum(int(a.size) * a.dtype.itemsize
              for a in (w1c, b1f, w2c, b2f, w3c, b3f))
        + out_dim * b_pad * 4
    )

    out_t = pl.pallas_call(
        mlp_kernel,
        out_shape=jax.ShapeDtypeStruct((out_dim, b_pad), jnp.float32),
        grid_spec=pl.GridSpec(
            grid=grid,
            in_specs=[
                pl.BlockSpec((in_dim, tile), lambda i: (0, i)),   # x^T tile (streams)
                pl.BlockSpec(w1c.shape, lambda i: (0, 0)),        # W1 (64, in)  resident
                pl.BlockSpec(b1f.shape, lambda i: (0, 0)),        # b1 (64, 1)   resident
                pl.BlockSpec(w2c.shape, lambda i: (0, 0)),        # W2 (32, 64)  resident
                pl.BlockSpec(b2f.shape, lambda i: (0, 0)),        # b2 (32, 1)   resident
                pl.BlockSpec(w3c.shape, lambda i: (0, 0)),        # W3 (out, 32) resident
                pl.BlockSpec(b3f.shape, lambda i: (0, 0)),        # b3 (out, 1)  resident
            ],
            out_specs=pl.BlockSpec((out_dim, tile), lambda i: (0, i)),
        ),
        compiler_params=pltpu.CompilerParams(
            dimension_semantics=("parallel",),
        ),
        cost_estimate=pl.CostEstimate(
            flops=flops, transcendentals=0, bytes_accessed=bytes_accessed),
    )(xt, w1c, b1f, w2c, b2f, w3c, b3f)

    # (out, b_pad) -> (B, out)
    return jnp.transpose(out_t[:, :B])


# Jitted entry point: fuses the wrapper-side transpose/pad/slice with the
# Pallas custom call so the layout plumbing costs nothing extra end-to-end.
salary_predictor_forward_jit = jax.jit(
    salary_predictor_forward, static_argnames=("batch_tile", "compute_dtype"))


def init_params(key, input_size, output_size):
    """Deterministic synthetic parameters matching the PyTorch module shapes.

    PyTorch stores Linear weights as (out, in); that orientation is exactly
    what the transposed-layout kernel consumes, so no transpose is needed.
    Biases are kept as (out, 1) columns so they broadcast across the lane
    (batch) axis inside the kernel.
    """
    ks = jax.random.split(key, 6)

    def linear_init(kw, kb, fan_in, fan_out):
        bound = 1.0 / jnp.sqrt(fan_in)
        w = jax.random.uniform(kw, (fan_out, fan_in), jnp.float32, -bound, bound)
        b = jax.random.uniform(kb, (fan_out,), jnp.float32, -bound, bound)
        return w, b.reshape(-1, 1)

    w1, b1 = linear_init(ks[0], ks[1], input_size, 64)
    w2, b2 = linear_init(ks[2], ks[3], 64, 32)
    w3, b3 = linear_init(ks[4], ks[5], 32, output_size)

    return {"w1": w1, "b1": b1, "w2": w2, "b2": b2, "w3": w3, "b3": b3}


def reference_forward(x, params):
    h1 = jnp.maximum(x @ params["w1"].T + params["b1"].T, 0.0)
    h2 = jnp.maximum(h1 @ params["w2"].T + params["b2"].T, 0.0)
    return h2 @ params["w3"].T + params["b3"].T


if __name__ == "__main__":
    key = jax.random.PRNGKey(0)
    k_param, k_x = jax.random.split(key)

    batch, input_size, output_size = 8, 16, 4
    params = init_params(k_param, input_size, output_size)
    x = jax.random.normal(k_x, (batch, input_size), jnp.float32)

    out = salary_predictor_forward_jit(x, params)   # f32 path: runs on v5e/v6e/v7x
    out = jax.block_until_ready(out)

    ref = reference_forward(x, params)
    assert out.shape == (batch, output_size)
    assert jnp.allclose(out, ref, atol=1e-5, rtol=1e-5)

    print("KERNEL_OK")
</pallas_src>

<mosaic_0001>
module attributes {stable_mosaic.version = 11 : i64} {
  func.func @mlp_kernel(%arg0: i32, %arg1: memref<16x128xf32, #tpu.memory_space<vmem>>, %arg2: memref<64x16xf32, #tpu.memory_space<vmem>>, %arg3: memref<64x1xf32, #tpu.memory_space<vmem>>, %arg4: memref<32x64xf32, #tpu.memory_space<vmem>>, %arg5: memref<32x1xf32, #tpu.memory_space<vmem>>, %arg6: memref<4x32xf32, #tpu.memory_space<vmem>>, %arg7: memref<4x1xf32, #tpu.memory_space<vmem>>, %arg8: memref<4x128xf32, #tpu.memory_space<vmem>>) attributes {dimension_semantics = [#tpu.dimension_semantics<parallel>], iteration_bounds = array<i64: 1>, scalar_prefetch = 0 : i64, scratch_operands = 0 : i64, tpu.core_type = #tpu.core_type<tc>, window_params = [{transform_indices = @transform_0, window_bounds = array<i64: 16, 128>}, {pipeline_mode = #tpu.pipeline_mode<synchronous>, transform_indices = @transform_1, window_bounds = array<i64: 64, 16>}, {pipeline_mode = #tpu.pipeline_mode<synchronous>, transform_indices = @transform_2, window_bounds = array<i64: 64, 1>}, {pipeline_mode = #tpu.pipeline_mode<synchronous>, transform_indices = @transform_3, window_bounds = array<i64: 32, 64>}, {pipeline_mode = #tpu.pipeline_mode<synchronous>, transform_indices = @transform_4, window_bounds = array<i64: 32, 1>}, {pipeline_mode = #tpu.pipeline_mode<synchronous>, transform_indices = @transform_5, window_bounds = array<i64: 4, 32>}, {pipeline_mode = #tpu.pipeline_mode<synchronous>, transform_indices = @transform_6, window_bounds = array<i64: 4, 1>}, {transform_indices = @transform_7, window_bounds = array<i64: 4, 128>}]} {
    %c0 = arith.constant 0 : index
    %c0_0 = arith.constant 0 : index
    %0 = vector.load %arg1[%c0, %c0_0] : memref<16x128xf32, #tpu.memory_space<vmem>>, vector<16x128xf32>
    %c0_1 = arith.constant 0 : index
    %c0_2 = arith.constant 0 : index
    %1 = vector.load %arg2[%c0_1, %c0_2] : memref<64x16xf32, #tpu.memory_space<vmem>>, vector<64x16xf32>
    %cst = arith.constant dense<0.000000e+00> : vector<64x128xf32>
    %2 = tpu.matmul %1, %0, %cst {dimension_numbers = #tpu.dot_dimension_numbers<[1], [0], [0], [1], [0, 0, 1, 1], [], []>} : vector<64x16xf32>, vector<16x128xf32>, vector<64x128xf32> -> vector<64x128xf32>
    %c0_3 = arith.constant 0 : index
    %c0_4 = arith.constant 0 : index
    %3 = vector.load %arg3[%c0_3, %c0_4] : memref<64x1xf32, #tpu.memory_space<vmem>>, vector<64x1xf32>
    %4 = vector.broadcast %3 : vector<64x1xf32> to vector<64x128xf32>
    %5 = arith.addf %2, %4 : vector<64x128xf32>
    %cst_5 = arith.constant 0.000000e+00 : f32
    %6 = vector.broadcast %cst_5 : f32 to vector<64x128xf32>
    %7 = arith.maximumf %5, %6 : vector<64x128xf32>
    %c0_6 = arith.constant 0 : index
    %c0_7 = arith.constant 0 : index
    %8 = vector.load %arg4[%c0_6, %c0_7] : memref<32x64xf32, #tpu.memory_space<vmem>>, vector<32x64xf32>
    %cst_8 = arith.constant dense<0.000000e+00> : vector<32x128xf32>
    %9 = tpu.matmul %8, %7, %cst_8 {dimension_numbers = #tpu.dot_dimension_numbers<[1], [0], [0], [1], [0, 0, 1, 1], [], []>} : vector<32x64xf32>, vector<64x128xf32>, vector<32x128xf32> -> vector<32x128xf32>
    %c0_9 = arith.constant 0 : index
    %c0_10 = arith.constant 0 : index
    %10 = vector.load %arg5[%c0_9, %c0_10] : memref<32x1xf32, #tpu.memory_space<vmem>>, vector<32x1xf32>
    %11 = vector.broadcast %10 : vector<32x1xf32> to vector<32x128xf32>
    %12 = arith.addf %9, %11 : vector<32x128xf32>
    %cst_11 = arith.constant 0.000000e+00 : f32
    %13 = vector.broadcast %cst_11 : f32 to vector<32x128xf32>
    %14 = arith.maximumf %12, %13 : vector<32x128xf32>
    %c0_12 = arith.constant 0 : index
    %c0_13 = arith.constant 0 : index
    %15 = vector.load %arg6[%c0_12, %c0_13] : memref<4x32xf32, #tpu.memory_space<vmem>>, vector<4x32xf32>
    %cst_14 = arith.constant dense<0.000000e+00> : vector<4x128xf32>
    %16 = tpu.matmul %15, %14, %cst_14 {dimension_numbers = #tpu.dot_dimension_numbers<[1], [0], [0], [1], [0, 0, 1, 1], [], []>} : vector<4x32xf32>, vector<32x128xf32>, vector<4x128xf32> -> vector<4x128xf32>
    %c0_15 = arith.constant 0 : index
    %c0_16 = arith.constant 0 : index
    %17 = vector.load %arg7[%c0_15, %c0_16] : memref<4x1xf32, #tpu.memory_space<vmem>>, vector<4x1xf32>
    %18 = vector.broadcast %17 : vector<4x1xf32> to vector<4x128xf32>
    %19 = arith.addf %16, %18 : vector<4x128xf32>
    %c0_17 = arith.constant 0 : index
    %c0_18 = arith.constant 0 : index
    %20 = vector.load %arg8[%c0_17, %c0_18] : memref<4x128xf32, #tpu.memory_space<vmem>>, vector<4x128xf32>
    tpu.vector_store %arg8[%c0_17, %c0_18], %19 {strides = array<i32>} : memref<4x128xf32, #tpu.memory_space<vmem>>, vector<4x128xf32>,
    return
  }
  func.func @transform_0(%arg0: i32) -> (i32, i32) {
    %c0_i32 = arith.constant 0 : i32
    %c0_i32_0 = arith.constant 0 : i32
    return %c0_i32, %arg0 : i32, i32
  }
  func.func @transform_1(%arg0: i32) -> (i32, i32) {
    %c0_i32 = arith.constant 0 : i32
    %c0_i32_0 = arith.constant 0 : i32
    %c0_i32_1 = arith.constant 0 : i32
    return %c0_i32, %c0_i32_0 : i32, i32
  }
  func.func @transform_2(%arg0: i32) -> (i32, i32) {
    %c0_i32 = arith.constant 0 : i32
    %c0_i32_0 = arith.constant 0 : i32
    %c0_i32_1 = arith.constant 0 : i32
    return %c0_i32, %c0_i32_0 : i32, i32
  }
  func.func @transform_3(%arg0: i32) -> (i32, i32) {
    %c0_i32 = arith.constant 0 : i32
    %c0_i32_0 = arith.constant 0 : i32
    %c0_i32_1 = arith.constant 0 : i32
    return %c0_i32, %c0_i32_0 : i32, i32
  }
  func.func @transform_4(%arg0: i32) -> (i32, i32) {
    %c0_i32 = arith.constant 0 : i32
    %c0_i32_0 = arith.constant 0 : i32
    %c0_i32_1 = arith.constant 0 : i32
    return %c0_i32, %c0_i32_0 : i32, i32
  }
  func.func @transform_5(%arg0: i32) -> (i32, i32) {
    %c0_i32 = arith.constant 0 : i32
    %c0_i32_0 = arith.constant 0 : i32
    %c0_i32_1 = arith.constant 0 : i32
    return %c0_i32, %c0_i32_0 : i32, i32
  }
  func.func @transform_6(%arg0: i32) -> (i32, i32) {
    %c0_i32 = arith.constant 0 : i32
    %c0_i32_0 = arith.constant 0 : i32
    %c0_i32_1 = arith.constant 0 : i32
    return %c0_i32, %c0_i32_0 : i32, i32
  }
  func.func @transform_7(%arg0: i32) -> (i32, i32) {
    %c0_i32 = arith.constant 0 : i32
    %c0_i32_0 = arith.constant 0 : i32
    return %c0_i32, %arg0 : i32, i32
  }
}

</mosaic_0001>

<bundles_post_ra>
// kernel: salary_predictor_forward.1
= control target key start
LH: loop header
LB: loop body
LE: loop exit
PB: predicated region body
PF: predicated region fallthrough
CT: control target
= control target key end

     0   :  { %vm84_vm0 = vcmask 130048   ;;  %v532_v3 = vmov 0   ;;  %vm250_vm1 = vcmask 523264   ;;  %v533_v60 = vmov 0.0   ;;  %s674_s0 = inlined_call_operand.vmem [shape: f32[16,128], index: 0, kind: input, shape index: {}]   ;;  %s675_s1 = inlined_call_operand.vmem [shape: f32[64,16], index: 1, kind: input, shape index: {}]   ;;  %s676_s2 = inlined_call_operand.vmem [shape: f32[64,1], index: 2, kind: input, shape index: {}]   ;;  %s677_s4 = inlined_call_operand.vmem [shape: f32[32,1], index: 4, kind: input, shape index: {}]   ;;  %s678_s6 = inlined_call_operand.vmem [shape: f32[4,1], index: 6, kind: input, shape index: {}]   ;;  %s679_s3 = inlined_call_operand.vmem [shape: f32[32,64], index: 3, kind: input, shape index: {}]   ;;  %s680_s5 = inlined_call_operand.vmem [shape: f32[4,32], index: 5, kind: input, shape index: {}]   ;;  %s681_s7 = inlined_call_operand.vmem [shape: f32[4,128], index: 7, kind: output, shape index: {}]  }
   0x1   :  { %v27_v0 = vld [vmem:[%s674_s0 + $0x8] sm:$0xff]  ;;  %v26_v1 = vld [vmem:[%s674_s0] sm:$0xff]  ;;  %530 = vset.pattern.permute.xlu0 %v532_v3  ;;  %531 = vset.pattern.permute.xlu1 %v532_v3  ;;  %v30_v5 = vld [vmem:[%s675_s1 + $0x10] sm:$0xff]  ;;  %vm534_vm2 = vmmov 0   ;;  %vm359_vm3 = vcmask 261120  }
   0x2   :  { %v28_v2 = vld [vmem:[%s675_s1] sm:$0xff]  ;;  %478 = vmatprep.subr.mxu0 %v27_v0  ;;  %v29_v4 = vld [vmem:[%s675_s1 + $0x8] sm:$0xff]  ;;  %v43_v6 = vld [vmem:[%s676_s2 + $0x38] sm:$0xff] }
   0x3   :  { %482 = vmatprep.mubr.msk.f32.mxu0 %vm84_vm0, %v28_v2  ;;  %479 = vmatpush3.msra.mxu0 %v27_v0  ;;  %v41_v7 = vld [vmem:[%s676_s2 + $0x28] sm:$0xff]  ;;  %v42_v8 = vld [vmem:[%s676_s2 + $0x30] sm:$0xff]  ;;  %v31_v9 = vld [vmem:[%s675_s1 + $0x18] sm:$0xff] }
   0x4   :  { %480 = vmatprep.subr.mxu0 %v26_v1  ;;  %81 = vperm.xlu0 %530, %v43_v6   ;;  %v40_v10 = vld [vmem:[%s676_s2 + $0x20] sm:$0xff]  ;;  %v39_v12 = vld [vmem:[%s676_s2 + $0x18] sm:$0xff]  ;;  %v33_v13 = vld [vmem:[%s675_s1 + $0x28] sm:$0xff] }
   0x5   :  { %481 = vmatpush3.msra.mxu0 %v26_v1  ;;  %71 = vperm.xlu1 %531, %v41_v7   ;;  %v32_v11 = vld [vmem:[%s675_s1 + $0x20] sm:$0xff]  ;;  %v38_v14 = vld [vmem:[%s676_s2 + $0x10] sm:$0xff]  ;;  %v37_v16 = vld [vmem:[%s676_s2 + $0x8] sm:$0xff] }
   0x6   :  { %483 = vmatmul.mubr.msk.f32.vlgmr.msra.gmra.mxu0 %vm84_vm0, %v29_v4  ;;  %v34_v15 = vld [vmem:[%s675_s1 + $0x30] sm:$0xff]  ;;  %v35_v17 = vld [vmem:[%s675_s1 + $0x38] sm:$0xff]  ;;  %v36_v18 = vld [vmem:[%s676_s2] sm:$0xff]  ;;  %516 = vmatprep.subr.mxu0 %v533_v60 }
   0x7   :  { %485 = vmatprep.mubr.msk.f32.mxu0 %vm84_vm0, %v30_v5  ;;  %v229_v19 = vld [vmem:[%s677_s4 + $0x18] sm:$0xff]  ;;  %v228_v20 = vld [vmem:[%s677_s4 + $0x10] sm:$0xff]  ;;  %v227_v21 = vld [vmem:[%s677_s4 + $0x8] sm:$0xff] }
   0x8   :  { %76 = vperm.xlu0 %530, %v42_v8   ;;  %v226_v22 = vld [vmem:[%s677_s4] sm:$0xff]  ;;  %v223_v57 = vld [vmem:[%s679_s3 + $0x8] sm:$0xff]  ;;  %v224_v58 = vld [vmem:[%s679_s3 + $0x10] sm:$0xff] }
   0x9   :  { %66 = vperm.xlu1 %531, %v40_v10   ;;  %v353_v23 = vld [vmem:[%s678_s6] sm:$0xf]  ;;  %v225_v59 = vld [vmem:[%s679_s3 + $0x18] sm:$0xff] }
   0xa   :  { %486 = vmatmul.mubr.msk.f32.gmra.mxu0 %vm84_vm0, %v31_v9  ;;  %v222_v24 = vld [vmem:[%s679_s3] sm:$0xff] }
   0xb   :  { %488 = vmatprep.mubr.msk.f32.mxu0 %vm84_vm0, %v32_v11  ;;  %510 = vmatprep.mubr.msk.f32.mxu1 %vm250_vm1, %v222_v24 }
   0xc   :  { %61 = vperm.xlu0 %530, %v39_v12  }
   0xd   :  { %56 = vperm.xlu1 %531, %v38_v14  }
   0xe   :  { %489 = vmatmul.mubr.msk.f32.gmra.mxu0 %vm84_vm0, %v33_v13  ;;  %v352_v13 = vld [vmem:[%s680_s5] sm:$0xf] }
   0xf   :  { %491 = vmatprep.mubr.msk.f32.mxu0 %vm84_vm0, %v34_v15 }
  0x10   :  { %51 = vperm.xlu0 %530, %v37_v16  }
  0x11   :  { %46 = vperm.xlu1 %531, %v36_v18  }
  0x12   :  { %492 = vmatmul.mubr.msk.f32.gmra.mxu0 %vm84_vm0, %v35_v17 }
  0x13   :  { %524 = vmatprep.mubr.msk.f32.mxu0 %vm534_vm2, %v533_v60 }
  0x14   :  { %247 = vperm.xlu0 %530, %v229_v19  }
  0x15   :  { %242 = vperm.xlu1 %531, %v228_v20  }
  0x18   :  { %237 = vperm.xlu0 %530, %v227_v21  }
  0x19   :  { %232 = vperm.xlu1 %531, %v226_v22  }
  0x1c   :  { %356 = vperm.xlu0 %530, %v353_v23  }
  0x7f   :  { %v82_v27 = vpop.permute.xlu0 %81 }
  0x80   :  { %v72_v28 = vpop.permute.xlu1 %71 }
  0x83   :  { %v77_v32 = vpop.permute.xlu0 %76 }
  0x84   :  { %v67_v33 = vpop.permute.xlu1 %66 }
  0x87   :  { %v62_v41 = vpop.permute.xlu0 %61 }
  0x88   :  { %v57_v42 = vpop.permute.xlu1 %56 }
  0x8b   :  { %v52_v49 = vpop.permute.xlu0 %51 }
  0x8c   :  { %v47_v50 = vpop.permute.xlu1 %46 }
  0x8f   :  { %v248_v61 = vpop.permute.xlu0 %247 }
  0x90   :  { %v243_v63 = vpop.permute.xlu1 %242 }
  0x93   :  { %v238_v3 = vpop.permute.xlu0 %237 }
  0x94   :  { %v233_v8 = vpop.permute.xlu1 %232 }
  0x97   :  { %v357_v14 = vpop.permute.xlu0 %356 }
  0xc6   :  { %v484_v25 = vpop.f32.mrf.mxu0 }
  0xc7   :  { %v181_v51 = vadd.f32 %v484_v25, %v52_v49 }
  0xc8   :  { %v175_v26 = vpop.f32.mrf.mxu0 }
  0xc9   :  { %v176_v53 = vadd.f32 %v175_v26, %v47_v50  ;;  %v215_v55 = vmax.f32 %v181_v51, 0.0 }
  0xca   :  { %v487_v29 = vpop.f32.mrf.mxu0 }
  0xcb   :  { %v191_v45 = vadd.f32 %v487_v29, %v62_v41  ;;  %v214_v56 = vmax.f32 %v176_v53, 0.0 }
  0xcc   :  { %v185_v30 = vpop.f32.mrf.mxu0 }
  0xcd   :  { %v186_v47 = vadd.f32 %v185_v30, %v57_v42  ;;  %v217_v52 = vmax.f32 %v191_v45, 0.0 }
  0xce   :  { %v490_v31 = vpop.f32.mrf.mxu0 }
  0xcf   :  { %v201_v38 = vadd.f32 %v490_v31, %v72_v28  ;;  %v216_v54 = vmax.f32 %v186_v47, 0.0 }
  0xd0   :  { %v195_v34 = vpop.f32.mrf.mxu0 }
  0xd1   :  { %v196_v43 = vadd.f32 %v195_v34, %v67_v33  ;;  %v219_v46 = vmax.f32 %v201_v38, 0.0 }
  0xd2   :  { %v493_v35 = vpop.f32.mrf.mxu0 }
  0xd3   :  { %v211_v36 = vadd.f32 %v493_v35, %v82_v27  ;;  %v218_v48 = vmax.f32 %v196_v43, 0.0 }
  0xd4   :  { %v205_v37 = vpop.f32.mrf.mxu0 }
  0xd5   :  { %v221_v39 = vmax.f32 %v211_v36, 0.0  ;;  %v206_v40 = vadd.f32 %v205_v37, %v77_v32 }
  0xd7   :  { %v220_v44 = vmax.f32 %v206_v40, 0.0  ;;  %494 = vmatprep.subr.mxu1 %v221_v39 }
  0xd8   :  { %495 = vmatpush3.msra.mxu1 %v221_v39 }
  0xd9   :  { %496 = vmatprep.subr.mxu1 %v220_v44 }
  0xda   :  { %497 = vmatpush3.msra.mxu1 %v220_v44 }
  0xdb   :  { %498 = vmatprep.subr.mxu1 %v219_v46 }
  0xdc   :  { %499 = vmatpush3.msra.mxu1 %v219_v46 }
  0xdd   :  { %500 = vmatprep.subr.mxu1 %v218_v48 }
  0xde   :  { %501 = vmatpush3.msra.mxu1 %v218_v48 }
  0xdf   :  { %502 = vmatprep.subr.mxu1 %v217_v52 }
  0xe0   :  { %503 = vmatpush3.msra.mxu1 %v217_v52 }
  0xe1   :  { %504 = vmatprep.subr.mxu1 %v216_v54 }
  0xe2   :  { %505 = vmatpush3.msra.mxu1 %v216_v54 }
  0xe3   :  { %506 = vmatprep.subr.mxu1 %v215_v55 }
  0xe4   :  { %507 = vmatpush3.msra.mxu1 %v215_v55 }
  0xe5   :  { %508 = vmatprep.subr.mxu1 %v214_v56 }
  0xe6   :  { %509 = vmatpush3.msra.mxu1 %v214_v56 }
  0xe7   :  { %511 = vmatmul.mubr.msk.f32.vlgmr.msra.gmra.mxu1 %vm250_vm1, %v223_v57 }
  0xe8   :  { %513 = vmatprep.mubr.msk.f32.mxu1 %vm250_vm1, %v224_v58 }
  0xeb   :  { %514 = vmatmul.mubr.msk.f32.gmra.mxu1 %vm250_vm1, %v225_v59 }
 0x1a7   :  { %v512_v62 = vpop.f32.mrf.mxu1 }
 0x1a8   :  { %v335_v5 = vadd.f32 %v512_v62, %v238_v3 }
 0x1a9   :  { %v329_v0 = vpop.f32.mrf.mxu1 }
 0x1aa   :  { %v330_v9 = vadd.f32 %v329_v0, %v233_v8  ;;  %v349_v11 = vmax.f32 %v335_v5, 0.0 }
 0x1ab   :  { %v515_v1 = vpop.f32.mrf.mxu1 }
 0x1ac   :  { %v345_v2 = vadd.f32 %v515_v1, %v248_v61  ;;  %v348_v12 = vmax.f32 %v330_v9, 0.0 }
 0x1ad   :  { %v339_v4 = vpop.f32.mrf.mxu1 }
 0x1ae   :  { %v351_v6 = vmax.f32 %v345_v2, 0.0  ;;  %v340_v7 = vadd.f32 %v339_v4, %v243_v63 }
 0x1b0   :  { %v350_v10 = vmax.f32 %v340_v7, 0.0  ;;  %517 = vmatpush3.msra.mxu0 %v351_v6 }
 0x1b1   :  { %518 = vmatprep.subr.mxu0 %v533_v60 }
 0x1b2   :  { %519 = vmatpush3.msra.mxu0 %v350_v10 }
 0x1b3   :  { %520 = vmatprep.subr.mxu0 %v533_v60 }
 0x1b4   :  { %521 = vmatpush3.msra.mxu0 %v349_v11 }
 0x1b5   :  { %522 = vmatprep.subr.mxu0 %v533_v60 }
 0x1b6   :  { %523 = vmatpush3.msra.mxu0 %v348_v12 }
 0x1b7   :  { %525 = vmatmul.mubr.msk.f32.vlgmr.msra.gmra.mxu0 %vm359_vm3, %v352_v13 }
 0x277   :  { %v429_v15 = vpop.f32.mrf.mxu0 }
 0x278   :  { %v430_v16 = vadd.f32 %v429_v15, %v357_v14 }
 0x279   :  { %v526_v17 = vpop.f32.mrf.mxu0 }
 0x27a   :  { %433 = vst [vmem:[%s681_s7] sm:$0xf] %v430_v16 }

</bundles_post_ra>
